<compile_context>
chip_gen: v7x
topology: tpu7x:2x2x1
jax: 0.10.0
libtpu: 0.0.40
codegen_flags: <defaults>
</compile_context>

<pallas_src>
import numpy as np
import jax
import jax.numpy as jnp
from jax.experimental import pallas as pl
from jax.experimental.pallas import tpu as pltpu


# ----------------------------- mask construction (glue, numpy) --------------
def block_diag_np(blocks):
    rows = sum(b.shape[0] for b in blocks)
    cols = sum(b.shape[1] for b in blocks)
    out = np.zeros((rows, cols), dtype=np.float32)
    r = c = 0
    for b in blocks:
        out[r:r + b.shape[0], c:c + b.shape[1]] = b
        r += b.shape[0]
        c += b.shape[1]
    return out


def build_pathway_mask(membership_mask, h0):
    # repeat membership mask for each module input node, then transpose
    # -> (n_feats, n_modules * h0)
    return np.repeat(membership_mask, h0, axis=0).T.astype(np.float32)


def build_separation_mask(in_dim, out_dim, n_modules):
    # block diagonal -> (n_modules*in_dim, n_modules*out_dim)
    return block_diag_np([np.ones((in_dim, out_dim), np.float32)] * n_modules)


# ----------------------------- Pallas kernel --------------------------------
def pmvae_kernel(x_ref, eps_ref, w1_ref, w2mu_ref, w2lv_ref, wd_ref, wm_ref,
                 bn_ref, out_ref):
    bn_eps = 0.001
    n_feats = w1_ref.shape[0]
    nm_h = w1_ref.shape[1]
    nm_lat = w2mu_ref.shape[1]

    def mm(a, w_ref):
        # bf16 MXU matmul with f32 accumulation (weights are pre-masked,
        # pre-transposed to (in, out) and already bf16)
        return jnp.dot(a.astype(jnp.bfloat16), w_ref[...],
                       preferred_element_type=jnp.float32)

    def bn(y, g_row, b_row, width):
        # training-mode BatchNorm1d: per-batch mean / biased variance (f32)
        g = bn_ref[g_row:g_row + 1, :width]
        b = bn_ref[b_row:b_row + 1, :width]
        mean = jnp.mean(y, axis=0, keepdims=True)
        var = jnp.mean((y - mean) ** 2, axis=0, keepdims=True)
        return (y - mean) * jax.lax.rsqrt(var + bn_eps) * g + b

    def elu(y):
        # clamp the exp argument so the unselected branch never produces inf
        return jnp.where(y > 0, y, jnp.exp(jnp.minimum(y, 0.0)) - 1.0)

    x = x_ref[...]

    # ---- encoder (linear biases dropped: zero-init AND cancelled by the BN
    #      mean subtraction that immediately follows each linear) ------------
    h = elu(bn(mm(x, w1_ref), 0, 1, nm_h))
    mu = bn(mm(h, w2mu_ref), 2, 3, nm_lat)
    logvar = bn(mm(h, w2lv_ref), 4, 5, nm_lat)

    # ---- reparametrization trick (eps ~ N(0,1) generated host-side) --------
    z = mu + jnp.exp(logvar * 0.5) * eps_ref[...]

    # ---- decoder + merger (bias_last_layer=False) ---------------------------
    mo = elu(bn(mm(z, wd_ref), 6, 7, nm_h))
    recon = mm(mo, wm_ref)

    # ---- single lane-dense output slab --------------------------------------
    out_ref[...] = jnp.zeros(out_ref.shape, out_ref.dtype)
    c = 0
    for val, w in ((recon, n_feats), (z, nm_lat), (mo, nm_h),
                   (mu, nm_lat), (logvar, nm_lat)):
        out_ref[:, c:c + w] = val
        c += w


# ----------------------------- wrapper ---------------------------------------
def pmvae_forward(x, eps, params):
    B = x.shape[0]
    n_feats = params["w1m"].shape[0]
    nm_h = params["w1m"].shape[1]
    nm_lat = params["w2m_mu"].shape[1]

    widths = (n_feats, nm_lat, nm_h, nm_lat, nm_lat)  # recon, z, mo, mu, logvar
    total = sum(widths)
    out_w = ((total + 127) // 128) * 128              # lane-dense slab width

    args = (x, eps, params["w1m"], params["w2m_mu"], params["w2m_lv"],
            params["wdm"], params["wmm"], params["bn"])

    vmem = pl.BlockSpec(memory_space=pltpu.MemorySpace.VMEM)
    slab = pl.pallas_call(
        pmvae_kernel,
        out_shape=jax.ShapeDtypeStruct((B, out_w), jnp.float32),
        in_specs=[vmem] * len(args),
        out_specs=vmem,
        compiler_params=pltpu.CompilerParams(vmem_limit_bytes=32 * 1024 * 1024),
    )(*args)

    outs = []
    c = 0
    for w in widths:
        outs.append(slab[:, c:c + w])
        c += w
    return tuple(outs)  # (global_recon, z, module_outputs, mu, logvar)


# pure-JAX reference (same mixed-precision math) for a sanity check
def pmvae_reference(x, eps, p):
    def mm(a, w_bf16):
        return jnp.dot(a.astype(jnp.bfloat16), w_bf16,
                       preferred_element_type=jnp.float32)

    def bn(y, g, b):
        m = jnp.mean(y, axis=0, keepdims=True)
        v = jnp.mean((y - m) ** 2, axis=0, keepdims=True)
        return (y - m) * jax.lax.rsqrt(v + 0.001) * g + b

    def elu(y):
        return jnp.where(y > 0, y, jnp.exp(jnp.minimum(y, 0.0)) - 1.0)

    bnp = p["bn"]
    nm_lat = p["w2m_mu"].shape[1]

    h = elu(bn(mm(x, p["w1m"]), bnp[0:1, :], bnp[1:2, :]))
    mu = bn(mm(h, p["w2m_mu"]), bnp[2:3, :nm_lat], bnp[3:4, :nm_lat])
    logvar = bn(mm(h, p["w2m_lv"]), bnp[4:5, :nm_lat], bnp[5:6, :nm_lat])
    z = mu + jnp.exp(logvar * 0.5) * eps
    mo = elu(bn(mm(z, p["wdm"]), bnp[6:7, :], bnp[7:8, :]))
    recon = mm(mo, p["wmm"])
    return recon, z, mo, mu, logvar


# ----------------------------- parameter setup --------------------------------
def make_params(key, membership_mask, hidden_layers, latent_dim):
    n_pathways, n_feats = membership_mask.shape
    # auxiliary fully-connected module
    mm_aug = np.vstack((membership_mask,
                        np.ones_like(membership_mask[0]))).astype(np.float32)
    n_modules = mm_aug.shape[0]
    h0 = hidden_layers[0]  # single hidden layer in this config

    pathway_mask = build_pathway_mask(mm_aug, h0)                 # (n_feats, nm*h0)
    sep_mask = build_separation_mask(h0, latent_dim, n_modules)   # (nm*h0, nm*lat)

    # weight-shaped masks (out, in), matching the PyTorch module
    enc_m1 = pathway_mask.T                                       # (nm*h0, n_feats)
    enc_m2 = np.hstack((sep_mask, sep_mask)).T                    # (2*nm*lat, nm*h0)
    dec_m = sep_mask                                              # (nm*h0, nm*lat)
    mrg_m = pathway_mask                                          # (n_feats, nm*h0)

    def init_w(k, out_f, in_f):
        limit = float(np.sqrt(6.0 / in_f))                        # sqrt(6/fan_in)
        return jax.random.uniform(k, (out_f, in_f), jnp.float32, -limit, limit)

    k1, k2, k3, k4 = jax.random.split(key, 4)
    w1 = init_w(k1, *enc_m1.shape)
    w2 = init_w(k2, *enc_m2.shape)
    wd = init_w(k3, *dec_m.shape)
    wm = init_w(k4, *mrg_m.shape)

    nm_h0 = n_modules * h0
    nm_lat = n_modules * latent_dim

    # fold mask into weight, transpose to (in, out), cast to bf16 for the MXU
    def fold(w, m):
        return (w * jnp.asarray(m)).T.astype(jnp.bfloat16)

    w1m = fold(w1, enc_m1)            # (n_feats, nm_h0)
    w2m = fold(w2, enc_m2)            # (nm_h0, 2*nm_lat)
    wdm = fold(wd, dec_m)             # (nm_lat, nm_h0)
    wmm = fold(wm, mrg_m)             # (nm_h0, n_feats)

    # packed BatchNorm parameter slab: rows = [g1, be1, g2_mu, be2_mu,
    # g2_lv, be2_lv, gd, bed] — fresh-module values (gamma=1, beta=0)
    bn = np.zeros((8, nm_h0), np.float32)
    bn[0, :] = 1.0
    bn[2, :nm_lat] = 1.0
    bn[4, :nm_lat] = 1.0
    bn[6, :] = 1.0

    params = dict(
        w1m=w1m,
        w2m_mu=w2m[:, :nm_lat],       # mu head of encoder layer 2
        w2m_lv=w2m[:, nm_lat:],       # logvar head of encoder layer 2
        wdm=wdm,
        wmm=wmm,
        bn=jnp.asarray(bn),
    )
    return params, n_modules


if __name__ == "__main__":
    n_pathways, n_feats = 4, 16
    latent_dim = 4
    hidden_layers = [8]
    batch = 2

    # deterministic membership mask (pathways, genes)
    membership_mask = np.zeros((n_pathways, n_feats), dtype=np.float32)
    for p in range(n_pathways):
        membership_mask[p, p * 4:(p + 1) * 4] = 1.0
        membership_mask[p, (p * 3) % n_feats] = 1.0  # small overlap between pathways

    key = jax.random.PRNGKey(0)
    kx, keps, kw = jax.random.split(key, 3)
    params, n_modules = make_params(kw, membership_mask, hidden_layers, latent_dim)

    x = jax.random.normal(kx, (batch, n_feats), jnp.float32)
    eps = jax.random.normal(keps, (batch, n_modules * latent_dim), jnp.float32)

    outs = pmvae_forward(x, eps, params)
    outs = jax.block_until_ready(outs)

    refs = pmvae_reference(x, eps, params)
    for o, r in zip(outs, refs):
        np.testing.assert_allclose(np.asarray(o), np.asarray(r), rtol=1e-2, atol=1e-2)

    print("KERNEL_OK")
</pallas_src>

<mosaic_0001>
module attributes {stable_mosaic.version = 11 : i64} {
  func.func @pmvae_kernel(%arg0: memref<2x16xf32, #tpu.memory_space<vmem>>, %arg1: memref<2x20xf32, #tpu.memory_space<vmem>>, %arg2: memref<16x40xbf16, #tpu.memory_space<vmem>>, %arg3: memref<40x20xbf16, #tpu.memory_space<vmem>>, %arg4: memref<40x20xbf16, #tpu.memory_space<vmem>>, %arg5: memref<20x40xbf16, #tpu.memory_space<vmem>>, %arg6: memref<40x16xbf16, #tpu.memory_space<vmem>>, %arg7: memref<8x40xf32, #tpu.memory_space<vmem>>, %arg8: memref<2x128xf32, #tpu.memory_space<vmem>>) attributes {dimension_semantics = [], scalar_prefetch = 0 : i64, scratch_operands = 0 : i64, tpu.core_type = #tpu.core_type<tc>} {
    %c0 = arith.constant 0 : index
    %c0_0 = arith.constant 0 : index
    %0 = vector.load %arg0[%c0, %c0_0] : memref<2x16xf32, #tpu.memory_space<vmem>>, vector<2x16xf32>
    %1 = arith.truncf %0 : vector<2x16xf32> to vector<2x16xbf16>
    %c0_1 = arith.constant 0 : index
    %c0_2 = arith.constant 0 : index
    %2 = vector.load %arg2[%c0_1, %c0_2] : memref<16x40xbf16, #tpu.memory_space<vmem>>, vector<16x40xbf16>
    %cst = arith.constant dense<0.000000e+00> : vector<2x40xf32>
    %3 = tpu.matmul %1, %2, %cst {dimension_numbers = #tpu.dot_dimension_numbers<[1], [0], [0], [1], [0, 0, 1, 1], [], []>} : vector<2x16xbf16>, vector<16x40xbf16>, vector<2x40xf32> -> vector<2x40xf32>
    %c0_3 = arith.constant 0 : index
    %c0_4 = arith.constant 0 : index
    %4 = vector.load %arg7[%c0_3, %c0_4] : memref<8x40xf32, #tpu.memory_space<vmem>>, vector<1x40xf32>
    %c1 = arith.constant 1 : index
    %c0_5 = arith.constant 0 : index
    %5 = vector.load %arg7[%c1, %c0_5] : memref<8x40xf32, #tpu.memory_space<vmem>>, vector<1x40xf32>
    %cst_6 = arith.constant dense<0.000000e+00> : vector<40xf32>
    %6 = vector.multi_reduction <add>, %3, %cst_6 [0] : vector<2x40xf32> to vector<40xf32>
    %7 = vector.shape_cast %6 : vector<40xf32> to vector<1x40xf32>
    %cst_7 = arith.constant 2.000000e+00 : f32
    %8 = vector.broadcast %cst_7 : f32 to vector<1x40xf32>
    %9 = arith.divf %7, %8 : vector<1x40xf32>
    %10 = vector.broadcast %9 : vector<1x40xf32> to vector<2x40xf32>
    %11 = arith.subf %3, %10 : vector<2x40xf32>
    %12 = arith.mulf %11, %11 : vector<2x40xf32>
    %cst_8 = arith.constant dense<0.000000e+00> : vector<40xf32>
    %13 = vector.multi_reduction <add>, %12, %cst_8 [0] : vector<2x40xf32> to vector<40xf32>
    %14 = vector.shape_cast %13 : vector<40xf32> to vector<1x40xf32>
    %cst_9 = arith.constant 2.000000e+00 : f32
    %15 = vector.broadcast %cst_9 : f32 to vector<1x40xf32>
    %16 = arith.divf %14, %15 : vector<1x40xf32>
    %17 = vector.broadcast %9 : vector<1x40xf32> to vector<2x40xf32>
    %18 = arith.subf %3, %17 : vector<2x40xf32>
    %cst_10 = arith.constant 1.000000e-03 : f32
    %19 = vector.broadcast %cst_10 : f32 to vector<1x40xf32>
    %20 = arith.addf %16, %19 : vector<1x40xf32>
    %21 = math.rsqrt %20 : vector<1x40xf32>
    %22 = vector.broadcast %21 : vector<1x40xf32> to vector<2x40xf32>
    %23 = arith.mulf %18, %22 : vector<2x40xf32>
    %24 = vector.broadcast %4 : vector<1x40xf32> to vector<2x40xf32>
    %25 = arith.mulf %23, %24 : vector<2x40xf32>
    %26 = vector.broadcast %5 : vector<1x40xf32> to vector<2x40xf32>
    %27 = arith.addf %25, %26 : vector<2x40xf32>
    %cst_11 = arith.constant 0.000000e+00 : f32
    %28 = vector.broadcast %cst_11 : f32 to vector<2x40xf32>
    %29 = arith.cmpf ogt, %27, %28 : vector<2x40xf32>
    %cst_12 = arith.constant 0.000000e+00 : f32
    %30 = vector.broadcast %cst_12 : f32 to vector<2x40xf32>
    %31 = arith.minimumf %27, %30 : vector<2x40xf32>
    %32 = math.exp %31 : vector<2x40xf32>
    %cst_13 = arith.constant 1.000000e+00 : f32
    %33 = vector.broadcast %cst_13 : f32 to vector<2x40xf32>
    %34 = arith.subf %32, %33 : vector<2x40xf32>
    %35 = arith.select %29, %27, %34 : vector<2x40xi1>, vector<2x40xf32>
    %36 = arith.truncf %35 : vector<2x40xf32> to vector<2x40xbf16>
    %c0_14 = arith.constant 0 : index
    %c0_15 = arith.constant 0 : index
    %37 = vector.load %arg3[%c0_14, %c0_15] : memref<40x20xbf16, #tpu.memory_space<vmem>>, vector<40x20xbf16>
    %cst_16 = arith.constant dense<0.000000e+00> : vector<2x20xf32>
    %38 = tpu.matmul %36, %37, %cst_16 {dimension_numbers = #tpu.dot_dimension_numbers<[1], [0], [0], [1], [0, 0, 1, 1], [], []>} : vector<2x40xbf16>, vector<40x20xbf16>, vector<2x20xf32> -> vector<2x20xf32>
    %c2 = arith.constant 2 : index
    %c0_17 = arith.constant 0 : index
    %39 = vector.load %arg7[%c2, %c0_17] : memref<8x40xf32, #tpu.memory_space<vmem>>, vector<1x20xf32>
    %c3 = arith.constant 3 : index
    %c0_18 = arith.constant 0 : index
    %40 = vector.load %arg7[%c3, %c0_18] : memref<8x40xf32, #tpu.memory_space<vmem>>, vector<1x20xf32>
    %cst_19 = arith.constant dense<0.000000e+00> : vector<20xf32>
    %41 = vector.multi_reduction <add>, %38, %cst_19 [0] : vector<2x20xf32> to vector<20xf32>
    %42 = vector.shape_cast %41 : vector<20xf32> to vector<1x20xf32>
    %cst_20 = arith.constant 2.000000e+00 : f32
    %43 = vector.broadcast %cst_20 : f32 to vector<1x20xf32>
    %44 = arith.divf %42, %43 : vector<1x20xf32>
    %45 = vector.broadcast %44 : vector<1x20xf32> to vector<2x20xf32>
    %46 = arith.subf %38, %45 : vector<2x20xf32>
    %47 = arith.mulf %46, %46 : vector<2x20xf32>
    %cst_21 = arith.constant dense<0.000000e+00> : vector<20xf32>
    %48 = vector.multi_reduction <add>, %47, %cst_21 [0] : vector<2x20xf32> to vector<20xf32>
    %49 = vector.shape_cast %48 : vector<20xf32> to vector<1x20xf32>
    %cst_22 = arith.constant 2.000000e+00 : f32
    %50 = vector.broadcast %cst_22 : f32 to vector<1x20xf32>
    %51 = arith.divf %49, %50 : vector<1x20xf32>
    %52 = vector.broadcast %44 : vector<1x20xf32> to vector<2x20xf32>
    %53 = arith.subf %38, %52 : vector<2x20xf32>
    %cst_23 = arith.constant 1.000000e-03 : f32
    %54 = vector.broadcast %cst_23 : f32 to vector<1x20xf32>
    %55 = arith.addf %51, %54 : vector<1x20xf32>
    %56 = math.rsqrt %55 : vector<1x20xf32>
    %57 = vector.broadcast %56 : vector<1x20xf32> to vector<2x20xf32>
    %58 = arith.mulf %53, %57 : vector<2x20xf32>
    %59 = vector.broadcast %39 : vector<1x20xf32> to vector<2x20xf32>
    %60 = arith.mulf %58, %59 : vector<2x20xf32>
    %61 = vector.broadcast %40 : vector<1x20xf32> to vector<2x20xf32>
    %62 = arith.addf %60, %61 : vector<2x20xf32>
    %63 = arith.truncf %35 : vector<2x40xf32> to vector<2x40xbf16>
    %c0_24 = arith.constant 0 : index
    %c0_25 = arith.constant 0 : index
    %64 = vector.load %arg4[%c0_24, %c0_25] : memref<40x20xbf16, #tpu.memory_space<vmem>>, vector<40x20xbf16>
    %cst_26 = arith.constant dense<0.000000e+00> : vector<2x20xf32>
    %65 = tpu.matmul %63, %64, %cst_26 {dimension_numbers = #tpu.dot_dimension_numbers<[1], [0], [0], [1], [0, 0, 1, 1], [], []>} : vector<2x40xbf16>, vector<40x20xbf16>, vector<2x20xf32> -> vector<2x20xf32>
    %c4 = arith.constant 4 : index
    %c0_27 = arith.constant 0 : index
    %66 = vector.load %arg7[%c4, %c0_27] : memref<8x40xf32, #tpu.memory_space<vmem>>, vector<1x20xf32>
    %c5 = arith.constant 5 : index
    %c0_28 = arith.constant 0 : index
    %67 = vector.load %arg7[%c5, %c0_28] : memref<8x40xf32, #tpu.memory_space<vmem>>, vector<1x20xf32>
    %cst_29 = arith.constant dense<0.000000e+00> : vector<20xf32>
    %68 = vector.multi_reduction <add>, %65, %cst_29 [0] : vector<2x20xf32> to vector<20xf32>
    %69 = vector.shape_cast %68 : vector<20xf32> to vector<1x20xf32>
    %cst_30 = arith.constant 2.000000e+00 : f32
    %70 = vector.broadcast %cst_30 : f32 to vector<1x20xf32>
    %71 = arith.divf %69, %70 : vector<1x20xf32>
    %72 = vector.broadcast %71 : vector<1x20xf32> to vector<2x20xf32>
    %73 = arith.subf %65, %72 : vector<2x20xf32>
    %74 = arith.mulf %73, %73 : vector<2x20xf32>
    %cst_31 = arith.constant dense<0.000000e+00> : vector<20xf32>
    %75 = vector.multi_reduction <add>, %74, %cst_31 [0] : vector<2x20xf32> to vector<20xf32>
    %76 = vector.shape_cast %75 : vector<20xf32> to vector<1x20xf32>
    %cst_32 = arith.constant 2.000000e+00 : f32
    %77 = vector.broadcast %cst_32 : f32 to vector<1x20xf32>
    %78 = arith.divf %76, %77 : vector<1x20xf32>
    %79 = vector.broadcast %71 : vector<1x20xf32> to vector<2x20xf32>
    %80 = arith.subf %65, %79 : vector<2x20xf32>
    %cst_33 = arith.constant 1.000000e-03 : f32
    %81 = vector.broadcast %cst_33 : f32 to vector<1x20xf32>
    %82 = arith.addf %78, %81 : vector<1x20xf32>
    %83 = math.rsqrt %82 : vector<1x20xf32>
    %84 = vector.broadcast %83 : vector<1x20xf32> to vector<2x20xf32>
    %85 = arith.mulf %80, %84 : vector<2x20xf32>
    %86 = vector.broadcast %66 : vector<1x20xf32> to vector<2x20xf32>
    %87 = arith.mulf %85, %86 : vector<2x20xf32>
    %88 = vector.broadcast %67 : vector<1x20xf32> to vector<2x20xf32>
    %89 = arith.addf %87, %88 : vector<2x20xf32>
    %cst_34 = arith.constant 5.000000e-01 : f32
    %90 = vector.broadcast %cst_34 : f32 to vector<2x20xf32>
    %91 = arith.mulf %89, %90 : vector<2x20xf32>
    %92 = math.exp %91 : vector<2x20xf32>
    %c0_35 = arith.constant 0 : index
    %c0_36 = arith.constant 0 : index
    %93 = vector.load %arg1[%c0_35, %c0_36] : memref<2x20xf32, #tpu.memory_space<vmem>>, vector<2x20xf32>
    %94 = arith.mulf %92, %93 : vector<2x20xf32>
    %95 = arith.addf %62, %94 : vector<2x20xf32>
    %96 = arith.truncf %95 : vector<2x20xf32> to vector<2x20xbf16>
    %c0_37 = arith.constant 0 : index
    %c0_38 = arith.constant 0 : index
    %97 = vector.load %arg5[%c0_37, %c0_38] : memref<20x40xbf16, #tpu.memory_space<vmem>>, vector<20x40xbf16>
    %cst_39 = arith.constant dense<0.000000e+00> : vector<2x40xf32>
    %98 = tpu.matmul %96, %97, %cst_39 {dimension_numbers = #tpu.dot_dimension_numbers<[1], [0], [0], [1], [0, 0, 1, 1], [], []>} : vector<2x20xbf16>, vector<20x40xbf16>, vector<2x40xf32> -> vector<2x40xf32>
    %c6 = arith.constant 6 : index
    %c0_40 = arith.constant 0 : index
    %99 = vector.load %arg7[%c6, %c0_40] : memref<8x40xf32, #tpu.memory_space<vmem>>, vector<1x40xf32>
    %c7 = arith.constant 7 : index
    %c0_41 = arith.constant 0 : index
    %100 = vector.load %arg7[%c7, %c0_41] : memref<8x40xf32, #tpu.memory_space<vmem>>, vector<1x40xf32>
    %cst_42 = arith.constant dense<0.000000e+00> : vector<40xf32>
    %101 = vector.multi_reduction <add>, %98, %cst_42 [0] : vector<2x40xf32> to vector<40xf32>
    %102 = vector.shape_cast %101 : vector<40xf32> to vector<1x40xf32>
    %cst_43 = arith.constant 2.000000e+00 : f32
    %103 = vector.broadcast %cst_43 : f32 to vector<1x40xf32>
    %104 = arith.divf %102, %103 : vector<1x40xf32>
    %105 = vector.broadcast %104 : vector<1x40xf32> to vector<2x40xf32>
    %106 = arith.subf %98, %105 : vector<2x40xf32>
    %107 = arith.mulf %106, %106 : vector<2x40xf32>
    %cst_44 = arith.constant dense<0.000000e+00> : vector<40xf32>
    %108 = vector.multi_reduction <add>, %107, %cst_44 [0] : vector<2x40xf32> to vector<40xf32>
    %109 = vector.shape_cast %108 : vector<40xf32> to vector<1x40xf32>
    %cst_45 = arith.constant 2.000000e+00 : f32
    %110 = vector.broadcast %cst_45 : f32 to vector<1x40xf32>
    %111 = arith.divf %109, %110 : vector<1x40xf32>
    %112 = vector.broadcast %104 : vector<1x40xf32> to vector<2x40xf32>
    %113 = arith.subf %98, %112 : vector<2x40xf32>
    %cst_46 = arith.constant 1.000000e-03 : f32
    %114 = vector.broadcast %cst_46 : f32 to vector<1x40xf32>
    %115 = arith.addf %111, %114 : vector<1x40xf32>
    %116 = math.rsqrt %115 : vector<1x40xf32>
    %117 = vector.broadcast %116 : vector<1x40xf32> to vector<2x40xf32>
    %118 = arith.mulf %113, %117 : vector<2x40xf32>
    %119 = vector.broadcast %99 : vector<1x40xf32> to vector<2x40xf32>
    %120 = arith.mulf %118, %119 : vector<2x40xf32>
    %121 = vector.broadcast %100 : vector<1x40xf32> to vector<2x40xf32>
    %122 = arith.addf %120, %121 : vector<2x40xf32>
    %cst_47 = arith.constant 0.000000e+00 : f32
    %123 = vector.broadcast %cst_47 : f32 to vector<2x40xf32>
    %124 = arith.cmpf ogt, %122, %123 : vector<2x40xf32>
    %cst_48 = arith.constant 0.000000e+00 : f32
    %125 = vector.broadcast %cst_48 : f32 to vector<2x40xf32>
    %126 = arith.minimumf %122, %125 : vector<2x40xf32>
    %127 = math.exp %126 : vector<2x40xf32>
    %cst_49 = arith.constant 1.000000e+00 : f32
    %128 = vector.broadcast %cst_49 : f32 to vector<2x40xf32>
    %129 = arith.subf %127, %128 : vector<2x40xf32>
    %130 = arith.select %124, %122, %129 : vector<2x40xi1>, vector<2x40xf32>
    %131 = arith.truncf %130 : vector<2x40xf32> to vector<2x40xbf16>
    %c0_50 = arith.constant 0 : index
    %c0_51 = arith.constant 0 : index
    %132 = vector.load %arg6[%c0_50, %c0_51] : memref<40x16xbf16, #tpu.memory_space<vmem>>, vector<40x16xbf16>
    %cst_52 = arith.constant dense<0.000000e+00> : vector<2x16xf32>
    %133 = tpu.matmul %131, %132, %cst_52 {dimension_numbers = #tpu.dot_dimension_numbers<[1], [0], [0], [1], [0, 0, 1, 1], [], []>} : vector<2x40xbf16>, vector<40x16xbf16>, vector<2x16xf32> -> vector<2x16xf32>
    %cst_53 = arith.constant 0.000000e+00 : f32
    %134 = vector.broadcast %cst_53 : f32 to vector<2x128xf32>
    %c0_54 = arith.constant 0 : index
    %c0_55 = arith.constant 0 : index
    %135 = vector.load %arg8[%c0_54, %c0_55] : memref<2x128xf32, #tpu.memory_space<vmem>>, vector<2x128xf32>
    tpu.vector_store %arg8[%c0_54, %c0_55], %134 {strides = array<i32>} : memref<2x128xf32, #tpu.memory_space<vmem>>, vector<2x128xf32>,
    %c0_56 = arith.constant 0 : index
    %c0_57 = arith.constant 0 : index
    %136 = vector.load %arg8[%c0_56, %c0_57] : memref<2x128xf32, #tpu.memory_space<vmem>>, vector<2x16xf32>
    tpu.vector_store %arg8[%c0_56, %c0_57], %133 {strides = array<i32>} : memref<2x128xf32, #tpu.memory_space<vmem>>, vector<2x16xf32>,
    %c0_58 = arith.constant 0 : index
    %c16 = arith.constant 16 : index
    %137 = vector.load %arg8[%c0_58, %c16] : memref<2x128xf32, #tpu.memory_space<vmem>>, vector<2x20xf32>
    tpu.vector_store %arg8[%c0_58, %c16], %95 {strides = array<i32>} : memref<2x128xf32, #tpu.memory_space<vmem>>, vector<2x20xf32>,
    %c0_59 = arith.constant 0 : index
    %c36 = arith.constant 36 : index
    %138 = vector.load %arg8[%c0_59, %c36] : memref<2x128xf32, #tpu.memory_space<vmem>>, vector<2x40xf32>
    tpu.vector_store %arg8[%c0_59, %c36], %130 {strides = array<i32>} : memref<2x128xf32, #tpu.memory_space<vmem>>, vector<2x40xf32>,
    %c0_60 = arith.constant 0 : index
    %c76 = arith.constant 76 : index
    %139 = vector.load %arg8[%c0_60, %c76] : memref<2x128xf32, #tpu.memory_space<vmem>>, vector<2x20xf32>
    tpu.vector_store %arg8[%c0_60, %c76], %62 {strides = array<i32>} : memref<2x128xf32, #tpu.memory_space<vmem>>, vector<2x20xf32>,
    %c0_61 = arith.constant 0 : index
    %c96 = arith.constant 96 : index
    %140 = vector.load %arg8[%c0_61, %c96] : memref<2x128xf32, #tpu.memory_space<vmem>>, vector<2x20xf32>
    tpu.vector_store %arg8[%c0_61, %c96], %89 {strides = array<i32>} : memref<2x128xf32, #tpu.memory_space<vmem>>, vector<2x20xf32>,
    return
  }
}

</mosaic_0001>

<bundles_post_ra>
// kernel: tpu_custom_call.1
= control target key start
LH: loop header
LB: loop body
LE: loop exit
PB: predicated region body
PF: predicated region fallthrough
CT: control target
= control target key end

     0   :  { %v684_v1 = vmov 0.0   ;;  %vm41_vm0 = vcmask 130048   ;;  %vm685_vm1 = vmmov 0   ;;  %s851_s0 = inlined_call_operand.vmem [shape: f32[2,16], index: 0, kind: input, shape index: {}]   ;;  %s852_s1 = inlined_call_operand.vmem [shape: f32[2,20], index: 1, kind: input, shape index: {}]   ;;  %s853_s2 = inlined_call_operand.vmem [shape: bf16[16,40], index: 2, kind: input, shape index: {}]   ;;  %s854_s3 = inlined_call_operand.vmem [shape: bf16[40,20], index: 3, kind: input, shape index: {}]   ;;  %s855_s4 = inlined_call_operand.vmem [shape: bf16[40,20], index: 4, kind: input, shape index: {}]   ;;  %s856_s5 = inlined_call_operand.vmem [shape: bf16[20,40], index: 5, kind: input, shape index: {}]   ;;  %s857_s6 = inlined_call_operand.vmem [shape: bf16[40,16], index: 6, kind: input, shape index: {}]   ;;  %s858_s7 = inlined_call_operand.vmem [shape: f32[8,40], index: 7, kind: input, shape index: {}]   ;;  %s859_s8 = inlined_call_operand.hbm [shape: f32[2,128], index: 8, kind: output, shape index: {}]  }
   0x1   :  { %v634_v0 = vld [vmem:[%s853_s2] sm:$0xff]   ;;  %583 = vmatprep.subr.bf16.mxu1 %v684_v1  ;;  %498 = vst [vmem:[#allocation2] sm:$0x3] %v684_v1  ;;  %599 = vmatprep.subr.bf16.mxu0 %v684_v1 }
   0x2   :  { %v31_v2 = vld [vmem:[%s851_s0] sm:$0x3]  ;;  %584 = vmatpush3.bf16.msra.mxu1 %v634_v0  ;;  %585 = vmatprep.mubr.msk.bf16.mxu1 %vm685_vm1, %v684_v1 }
   0x3   :  { %v32_v3 = vpack.c.bf16 %v31_v2, %v31_v2  ;;  %589 = vmatprep.subr.bf16.mxu1 %v684_v1  ;;  %605 = vmatprep.mubr.msk.bf16.mxu0 %vm685_vm1, %v684_v1 }
   0x5   :  { %586 = vmatmul.mubr.msk.bf16.vlgmr.msra.gmra.mrb[0].mxu1 %vm41_vm0, %v32_v3 }
   0x6   :  { %595 = vmatprep.mubr.msk.bf16.mxu1 %vm685_vm1, %v684_v1 }
   0x7   :  { %13 = vsyncpa [#allocation3], 0  ;;  %v635_v4 = vld [vmem:[%s854_s3] sm:$0xff]   ;;  %v637_v6 = vld [vmem:[%s854_s3 + $0x8] sm:$0xff]   ;;  %vm151_vm2 = vcmask 1043456   ;;  %vm87_vm3 = vcmask 320512  }
   0x8   :  { %v636_v5 = vld [vmem:[%s855_s4] sm:$0xff]   ;;  %590 = vmatpush3.bf16.msra.mxu1 %v635_v4  ;;  %v638_v7 = vld [vmem:[%s855_s4 + $0x8] sm:$0xff]   ;;  %v639_v8 = vld [vmem:[%s854_s3 + $0x10] ss:$0 sps:$4 sm:$0xff]   ;;  %vm147_vm5 = vcmask 326656   ;;  %vm348_vm6 = vcmask 1041408  }
   0x9   :  { %600 = vmatpush3.bf16.msra.mxu0 %v636_v5  ;;  %591 = vmatprep.subr.bf16.mxu1 %v684_v1  ;;  %v640_v9 = vld [vmem:[%s855_s4 + $0x10] ss:$0 sps:$4 sm:$0xff]   ;;  %v153_v10 = vsel %vm151_vm2, %v639_v8, 0  ;;  %v541_v36 = vld [vmem:[%s858_s7] ss:$0 sm:$0xff]  ;;  %vm197_vm7 = vcmask 156672  }
   0xa   :  { %601 = vmatprep.subr.bf16.mxu0 %v684_v1  ;;  %v250_v11 = vsel %vm151_vm2, %v640_v9, 0  ;;  %v542_v38 = vld [vmem:[%s858_s7 + $0x1] ss:$0 sm:$0xff]  ;;  %v642_v48 = vld [vmem:[%s856_s5 + $0x8] ss:$0 sps:$4 sm:$0x33]  }
   0xb   :  { %v641_v47 = vld [vmem:[%s856_s5] sm:$0xff]   ;;  %v350_v49 = vsel %vm348_vm6, %v642_v48, 0  ;;  %s686_s2 = smov 76   ;;  %s687_s9 = smov 96   ;;  %vm344_vm8 = vcmask 162816   ;;  %vm499_vm10 = vcmask 123904  }
   0xc   :  { %592 = vmatpush3.bf16.msra.mxu1 %v637_v6  ;;  %s688_s12 = smov 16   ;;  %s689_s19 = smov 36   ;;  %vm505_vm11 = vcmask 287872   ;;  %vm511_vm12 = vcmask 615712   ;;  %vm517_vm13 = vcmask 779872   ;;  %vm523_vm14 = vcmask 943872  }
   0xd   :  { %602 = vmatpush3.bf16.msra.mxu0 %v638_v7  ;;  %593 = vmatprep.subr.bf16.mxu1 %v684_v1 }
   0xe   :  { %603 = vmatprep.subr.bf16.mxu0 %v684_v1 }
  0x10   :  { %594 = vmatpush3.bf16.msra.mxu1 %v153_v10 }
  0x11   :  { %604 = vmatpush3.bf16.msra.mxu0 %v250_v11  ;;  %609 = vmatprep.subr.bf16.mxu1 %v684_v1 }
  0x12   :  { %617 = vmatprep.subr.bf16.mxu0 %v684_v1 }
  0xd8   :  { %v79_v12 = vpop.f32.mrb[0].mxu1 }
  0xd9   :  { %v88_v13 = vsel %vm87_vm3, %v79_v12, 0.0  ;;  %v587_v14 = vpop.f32.mrb[1].mxu1 }
  0xda   :  { %v89_v15 = vrot.slane %v88_v13, 4  ;;  %v82_v16 = vpop.f32.mrb[2].mxu1 }
  0xdb   :  { %v588_v17 = vpop.f32.mrb[3].mxu1 }
  0xdc   :  { %v90_v18 = vadd.f32 %v89_v15, %v88_v13 }
  0xde   :  { %v91_v19 = vrot.slane %v90_v18, 2 }
  0xe0   :  { %v92_v20 = vadd.f32 %v91_v19, %v90_v18 }
  0xe2   :  { %v93_v21 = vrot.slane %v92_v20, 1 }
  0xe4   :  { %v94_v22 = vadd.f32 %v93_v21, %v92_v20 }
  0xe6   :  { %v96_v23 = vmul.f32 0.5, %v94_v22 }
  0xe8   :  { %v97_v24 = vsub.f32 %v79_v12, %v96_v23 }
  0xea   :  { %v98_v25 = vmul.f32 %v97_v24, %v97_v24 }
  0xec   :  { %v99_v26 = vsel %vm87_vm3, %v98_v25, 0.0 }
  0xed   :  { %v100_v27 = vrot.slane %v99_v26, 4 }
  0xef   :  { %v101_v28 = vadd.f32 %v100_v27, %v99_v26 }
  0xf1   :  { %v102_v29 = vrot.slane %v101_v28, 2 }
  0xf3   :  { %v103_v30 = vadd.f32 %v102_v29, %v101_v28 }
  0xf5   :  { %v104_v31 = vrot.slane %v103_v30, 1 }
  0xf7   :  { %v105_v32 = vadd.f32 %v104_v31, %v103_v30 }
  0xf9   :  { %v106_v33 = vmul.f32 0.5, %v105_v32 }
  0xfb   :  { %v107_v34 = vadd.f32 0.001, %v106_v33 }
  0xfd   :  { %646 = vrsqrt.f32 %v107_v34  ;;  %v548_v34 = vld [vmem:[%s858_s7 + $0x2] ss:$0 sm:$0xff] }
 0x107   :  { %v647_v35 = vpop.eup %646 }
 0x108   :  { %v109_v37 = vmul.f32 %v647_v35, %v97_v24 }
 0x10a   :  { %v114_v39 = vmul.f32 %v541_v36, %v109_v37  ;;  %v554_v37 = vld [vmem:[%s858_s7 + $0x4] ss:$0 sm:$0xff] }
 0x10c   :  { %v119_v40 = vadd.f32 %v542_v38, %v114_v39  ;;  %v549_v39 = vld [vmem:[%s858_s7 + $0x3] ss:$0 sm:$0xff] }
 0x10e   :  { %v121_v41 = vmin.f32 %v119_v40, 0.0  ;;  %vm120_vm4 = vcmp.gt.f32.partialorder %v119_v40, 0.0 }
 0x110   :  { %v122_v42 = vmul.f32 1.442695, %v121_v41  ;;  %v555_v41 = vld [vmem:[%s858_s7 + $0x5] ss:$0 sm:$0xff] }
 0x112   :  { %648 = vpow2.f32 %v122_v42 }
 0x11c   :  { %v649_v43 = vpop.eup %648 }
 0x11d   :  { %v543_v44 = vadd.f32 -1.0, %v649_v43 }
 0x11f   :  { %v125_v45 = vsel %vm120_vm4, %v119_v40, %v543_v44 }
 0x120   :  { %v126_v46 = vpack.c.bf16 %v125_v45, %v125_v45 }
 0x122   :  { %596 = vmatmul.mubr.msk.bf16.vlgmr.msra.gmra.mrb[4].mxu1 %vm147_vm5, %v126_v46  ;;  %606 = vmatmul.mubr.msk.bf16.vlgmr.msra.gmra.mrb[0].mxu0 %vm147_vm5, %v126_v46 }
 0x123   :  { %613 = vmatprep.mubr.msk.bf16.mxu1 %vm685_vm1, %v684_v1  ;;  %623 = vmatprep.mubr.msk.bf16.mxu0 %vm685_vm1, %v684_v1 }
 0x124   :  { %610 = vmatpush3.bf16.msra.mxu1 %v641_v47  ;;  %v328_v47 = vld [vmem:[%s852_s1] sm:$0x3] }
 0x125   :  { %611 = vmatprep.subr.bf16.mxu1 %v684_v1 }
 0x128   :  { %612 = vmatpush3.bf16.msra.mxu1 %v350_v49 }
 0x1f5   :  { %v189_v50 = vpop.f32.mrb[4].mxu1  ;;  %v286_v51 = vpop.f32.mrb[0].mxu0 }
 0x1f6   :  { %v198_v52 = vsel %vm197_vm7, %v189_v50, 0.0  ;;  %v294_v53 = vsel %vm197_vm7, %v286_v51, 0.0  ;;  %v597_v54 = vpop.f32.mrb[5].mxu1  ;;  %v607_v55 = vpop.f32.mrb[1].mxu0 }
 0x1f7   :  { %v199_v56 = vrot.slane %v198_v52, 4  ;;  %v295_v57 = vrot.slane %v294_v53, 4  ;;  %v192_v58 = vpop.f32.mrb[6].mxu1  ;;  %v289_v59 = vpop.f32.mrb[2].mxu0  ;;  %v645_v54 = vld [vmem:[%s857_s6 + $0x10] ss:$0 sps:$4 sm:$0xff]  }
 0x1f8   :  { %v598_v60 = vpop.f32.mrb[7].mxu1  ;;  %v608_v61 = vpop.f32.mrb[3].mxu0  ;;  %v456_v55 = vsel %vm151_vm2, %v645_v54, 0 }
 0x1f9   :  { %v200_v62 = vadd.f32 %v199_v56, %v198_v52  ;;  %v296_v63 = vadd.f32 %v295_v57, %v294_v53  ;;  %v643_v52 = vld [vmem:[%s857_s6] sm:$0xff]   ;;  %v644_v53 = vld [vmem:[%s857_s6 + $0x8] sm:$0xff]  }
 0x1fa   :  { %618 = vmatpush3.bf16.msra.mxu0 %v643_v52 }
 0x1fb   :  { %v201_v0 = vrot.slane %v200_v62, 2  ;;  %v297_v2 = vrot.slane %v296_v63, 2  ;;  %619 = vmatprep.subr.bf16.mxu0 %v684_v1 }
 0x1fd   :  { %v202_v3 = vadd.f32 %v201_v0, %v200_v62  ;;  %v298_v4 = vadd.f32 %v297_v2, %v296_v63 }
 0x1fe   :  { %620 = vmatpush3.bf16.msra.mxu0 %v644_v53 }
 0x1ff   :  { %v203_v5 = vrot.slane %v202_v3, 1  ;;  %v299_v6 = vrot.slane %v298_v4, 1  ;;  %621 = vmatprep.subr.bf16.mxu0 %v684_v1 }
 0x201   :  { %v204_v7 = vadd.f32 %v203_v5, %v202_v3  ;;  %v300_v8 = vadd.f32 %v299_v6, %v298_v4 }
 0x202   :  { %622 = vmatpush3.bf16.msra.mxu0 %v456_v55 }
 0x203   :  { %v205_v9 = vmul.f32 0.5, %v204_v7  ;;  %v301_v10 = vmul.f32 0.5, %v300_v8 }
 0x205   :  { %v206_v11 = vsub.f32 %v189_v50, %v205_v9  ;;  %v302_v12 = vsub.f32 %v286_v51, %v301_v10 }
 0x207   :  { %v207_v13 = vmul.f32 %v206_v11, %v206_v11  ;;  %v303_v14 = vmul.f32 %v302_v12, %v302_v12 }
 0x209   :  { %v208_v15 = vsel %vm197_vm7, %v207_v13, 0.0  ;;  %v304_v16 = vsel %vm197_vm7, %v303_v14, 0.0 }
 0x20a   :  { %v209_v17 = vrot.slane %v208_v15, 4  ;;  %v305_v18 = vrot.slane %v304_v16, 4 }
 0x20c   :  { %v210_v19 = vadd.f32 %v209_v17, %v208_v15  ;;  %v306_v20 = vadd.f32 %v305_v18, %v304_v16  ;;  %v559_v16 = vld [vmem:[%s858_s7 + $0x6] ss:$0 sm:$0xff]  ;;  %v560_v18 = vld [vmem:[%s858_s7 + $0x7] ss:$0 sm:$0xff]  ;;  %s690_s7 = smov [#allocation2]  }
 0x20d   :  { %s531_s20 = sshll.u32 %s690_s7, 4  ;;  %s532_s20 = int_to_ptr.vmem [resolvable:$true] %s531_s20 }
 0x20e   :  { %v211_v21 = vrot.slane %v210_v19, 2  ;;  %v307_v22 = vrot.slane %v306_v20, 2  ;;  %s660_s21 = scalar_lea.vmem %s532_s20, 32  ;;  %p665_p1 = scmp.lt.s32.totalorder %s532_s20, %s532_s20 }
 0x20f   :  { %p661_p0 = scmp.ne.s32.totalorder %s532_s20, %s660_s21  ;;  %p666_p2 = scmp.lt.s32.totalorder %s660_s21, %s660_s21 }
 0x210   :  { %v212_v23 = vadd.f32 %v211_v21, %v210_v19  ;;  %v308_v24 = vadd.f32 %v307_v22, %v306_v20 }
 0x211   :  { %p667_p3 = por %p666_p2, %p665_p1 }
 0x212   :  { %v213_v25 = vrot.slane %v212_v23, 1  ;;  %v309_v26 = vrot.slane %v308_v24, 1 }
 0x213   :  { %p668_p4 = pnand %p667_p3, %p661_p0 }
 0x214   :  { %v214_v27 = vadd.f32 %v213_v25, %v212_v23  ;;  %v310_v28 = vadd.f32 %v309_v26, %v308_v24 }
 0x216   :  { %v215_v29 = vmul.f32 0.5, %v214_v27  ;;  %v311_v30 = vmul.f32 0.5, %v310_v28 }
 0x218   :  { %v216_v31 = vadd.f32 0.001, %v215_v29  ;;  %v312_v32 = vadd.f32 0.001, %v311_v30 }
 0x21a   :  { %650 = vrsqrt.f32 %v216_v31 }
 0x21b   :  { %652 = vrsqrt.f32 %v312_v32 }
 0x224   :  { %v651_v33 = vpop.eup %650 }
 0x225   :  { %v653_v35 = vpop.eup %652  ;;  %v218_v36 = vmul.f32 %v651_v33, %v206_v11 }
 0x226   :  { %v314_v38 = vmul.f32 %v653_v35, %v302_v12 }
 0x227   :  { %v223_v40 = vmul.f32 %v548_v34, %v218_v36 }
 0x228   :  { %v319_v42 = vmul.f32 %v554_v37, %v314_v38 }
 0x229   :  { %v228_v43 = vadd.f32 %v549_v39, %v223_v40 }
 0x22a   :  { %v324_v44 = vadd.f32 %v555_v41, %v319_v42 }
 0x22b   :  { %514 = vrot.lane.b32.xlu1 %v228_v43, %s686_s2 }
 0x22c   :  { %v325_v45 = vmul.f32 0.5, %v324_v44 }
 0x22e   :  { %v326_v46 = vmul.f32 1.442695, %v325_v45 }
 0x22f   :  { %520 = vrot.lane.b32.xlu1 %v324_v44, %s687_s9 }
 0x230   :  { %654 = vpow2.f32 %v326_v46 }
 0x23a   :  { %v655_v48 = vpop.eup %654 }
 0x23b   :  { %v329_v49 = vmul.f32 %v655_v48, %v328_v47 }
 0x23d   :  { %v330_v50 = vadd.f32 %v329_v49, %v228_v43 }
 0x23f   :  { %502 = vrot.lane.b32.xlu0 %v330_v50, %s688_s12  ;;  %v331_v51 = vpack.c.bf16 %v330_v50, %v330_v50 }
 0x241   :  { %614 = vmatmul.mubr.msk.bf16.vlgmr.msra.gmra.mrb[8].mxu1 %vm344_vm8, %v331_v51 }
 0x29d   :  { %v515_v27 = vpop.permute.xlu1 %514 }
 0x2a1   :  { %v521_v34 = vpop.permute.xlu1 %520 }
 0x2b1   :  { %v503_v28 = vpop.permute.xlu0 %502 }
 0x314   :  { %v386_v56 = vpop.f32.mrb[8].mxu1 }
 0x315   :  { %v394_v57 = vsel %vm87_vm3, %v386_v56, 0.0  ;;  %v615_v58 = vpop.f32.mrb[9].mxu1 }
 0x316   :  { %v395_v59 = vrot.slane %v394_v57, 4  ;;  %v389_v60 = vpop.f32.mrb[10].mxu1 }
 0x317   :  { %v616_v61 = vpop.f32.mrb[11].mxu1 }
 0x318   :  { %v396_v62 = vadd.f32 %v395_v59, %v394_v57 }
 0x31a   :  { %v397_v63 = vrot.slane %v396_v62, 2 }
 0x31c   :  { %v398_v0 = vadd.f32 %v397_v63, %v396_v62 }
 0x31e   :  { %v399_v2 = vrot.slane %v398_v0, 1 }
 0x320   :  { %v400_v3 = vadd.f32 %v399_v2, %v398_v0 }
 0x322   :  { %v401_v4 = vmul.f32 0.5, %v400_v3 }
 0x324   :  { %v402_v5 = vsub.f32 %v386_v56, %v401_v4 }
 0x326   :  { %v403_v6 = vmul.f32 %v402_v5, %v402_v5 }
 0x328   :  { %v404_v1 = vsel %vm87_vm3, %v403_v6, 0.0 }
 0x329   :  { %v405_v7 = vrot.slane %v404_v1, 4 }
 0x32b   :  { %v406_v8 = vadd.f32 %v405_v7, %v404_v1 }
 0x32d   :  { %v407_v9 = vrot.slane %v406_v8, 2 }
 0x32f   :  { %v408_v10 = vadd.f32 %v407_v9, %v406_v8 }
 0x331   :  { %v409_v11 = vrot.slane %v408_v10, 1 }
 0x333   :  { %v410_v12 = vadd.f32 %v409_v11, %v408_v10 }
 0x335   :  { %v411_v13 = vmul.f32 0.5, %v410_v12 }
 0x337   :  { %v412_v14 = vadd.f32 0.001, %v411_v13 }
 0x339   :  { %656 = vrsqrt.f32 %v412_v14 }
 0x343   :  { %v657_v15 = vpop.eup %656 }
 0x344   :  { %v414_v17 = vmul.f32 %v657_v15, %v402_v5 }
 0x346   :  { %v419_v19 = vmul.f32 %v559_v16, %v414_v17 }
 0x348   :  { %v424_v20 = vadd.f32 %v560_v18, %v419_v19 }
 0x34a   :  { %v426_v21 = vmin.f32 %v424_v20, 0.0  ;;  %vm425_vm9 = vcmp.gt.f32.partialorder %v424_v20, 0.0 }
 0x34c   :  { %v427_v22 = vmul.f32 1.442695, %v426_v21 }
 0x34e   :  { %658 = vpow2.f32 %v427_v22 }
 0x358   :  { %v659_v23 = vpop.eup %658 }
 0x359   :  { %v561_v24 = vadd.f32 -1.0, %v659_v23 }
 0x35b   :  { %v430_v25 = vsel %vm425_vm9, %v424_v20, %v561_v24 }
 0x35c   :  { %508 = vrot.lane.b32.xlu0 %v430_v25, %s689_s19  ;;  %v431_v26 = vpack.c.bf16 %v430_v25, %v430_v25 }
 0x35e   :  { %624 = vmatmul.mubr.msk.bf16.vlgmr.msra.gmra.mrb[4].mxu0 %vm147_vm5, %v431_v26 }
 0x3ce   :  { %v509_v31 = vpop.permute.xlu0 %508 }
 0x431   :  { %v492_v29 = vpop.f32.mrb[4].mxu0 }
 0x432   :  { %500 = vst.msk [vmem:[#allocation2] sm:$0x3] %vm499_vm10, %v492_v29  ;;  %v625_v30 = vpop.f32.mrb[5].mxu0 }
 0x433   :  { %506 = vst.msk [vmem:[#allocation2] sm:$0x3] %vm505_vm11, %v503_v28  ;;  %v495_v32 = vpop.f32.mrb[6].mxu0 }
 0x434   :  { %v626_v33 = vpop.f32.mrb[7].mxu0  ;;  %512 = vst.msk [vmem:[#allocation2] sm:$0x3] %vm511_vm12, %v509_v31 }
 0x435   :  { %518 = vst.msk [vmem:[#allocation2] sm:$0x3] %vm517_vm13, %v515_v27 }
 0x436   :  { %524 = vst.msk [vmem:[#allocation2] sm:$0x3] %vm523_vm14, %v521_v34 }
 0x437   :  { %671 = shalt.err (!%p668_p4)
}
 0x438   :  { %s672_s24 = scalar_lea.hbm %s859_s8, 32 }
 0x439   :  { %p673_p5 = scmp.ne.s32.totalorder %s859_s8, %s672_s24  ;;  %p676_p6 = scmp.lt.u32.totalorder %s672_s24, %s859_s8 }
 0x43b   :  { %p678_p7 = pnand %p676_p6, %p673_p5 }
 0x43d   :  { %681 = shalt.err (!%p678_p7)
}
 0x43e   :  { %534 = dma.vmem_to_hbm [thread:$0]  %s532_s20, 32, %s859_s8, [#allocation3]  }
 0x43f   :  { %682 = dma.done.wait [#allocation3], 32  }
 0x440   :  { %683 = vsyncadd [#allocation3], 4294967264 }
 0x441   :  { %538 = vsyncpa [#allocation3], 1 }

</bundles_post_ra>
